<compile_context>
chip_gen: v5e
topology: v5e:2x2
jax: 0.10.0
libtpu: 0.0.40
codegen_flags: <defaults>
</compile_context>

<pallas_src>
import functools
import math

import jax
import jax.numpy as jnp
from jax import lax
from jax.experimental import pallas as pl
from jax.experimental.pallas import tpu as pltpu


# ----------------------------------------------------------------------------
# Fused kernel: three bias-augmented cross-attention blocks with residual.
# ----------------------------------------------------------------------------
def _fused_encoder_kernel(
    ope_ref, ma_ref, veh_ref,                     # (B*L, E) batch-folded embeddings
    ma_bias_ref, veh_bias_ref, job_bias_ref,      # (B, Lq, Lk_total) additive biases
    wqkv_ma_ref, wo_ma_ref,                       # (E, 3E) / (E, E) packed weights
    wqkv_veh_ref, wo_veh_ref,
    wqkv_job_ref, wo_job_ref,
    ope_out_ref, ma_out_ref, veh_out_ref,         # (B, L, E) outputs
    *, batch, n_opes, n_mas, n_vehs):
  f32 = jnp.float32
  E = ope_ref.shape[-1]

  ope = ope_ref[...].astype(f32)                  # (B*n_opes, E)
  ma = ma_ref[...].astype(f32)                    # (B*n_mas,  E)
  veh = veh_ref[...].astype(f32)                  # (B*n_vehs, E)

  def attention_block(x2, lq, kv_segments, bias_ref, wqkv_ref, wo_ref, out_ref):
    """x2: (batch*lq, E) folded queries.
    kv_segments: list of (kv2, lk); kv2 is a folded (batch*lk, E) tensor, or
    None when the segment IS the query tensor (its K/V columns come for free
    from the same packed projection push)."""
    wqkv = wqkv_ref[...].astype(f32)              # (E, 3E); 1/sqrt(E) folded into Wq cols

    # One MXU push gives Q (and K/V when x is also a key/value segment).
    qkv = jnp.dot(x2, wqkv, preferred_element_type=f32)          # (B*lq, 3E)
    q = qkv[:, :E].reshape(batch, lq, E)

    ks, vs = [], []
    for kv2, lk in kv_segments:
      if kv2 is None:                             # segment == query tensor: reuse qkv
        ks.append(qkv[:, E:2 * E].reshape(batch, lq, E))
        vs.append(qkv[:, 2 * E:].reshape(batch, lq, E))
      else:                                       # one [K|V] push for this segment
        kvp = jnp.dot(kv2, wqkv[:, E:], preferred_element_type=f32)   # (B*lk, 2E)
        ks.append(kvp[:, :E].reshape(batch, lk, E))
        vs.append(kvp[:, E:].reshape(batch, lk, E))

    # Concatenate key/value segments along the (sublane-aligned) key axis so a
    # single batched scores einsum + one max/exp/sum covers the whole key set.
    k_cat = ks[0] if len(ks) == 1 else jnp.concatenate(ks, axis=1)
    v_cat = vs[0] if len(vs) == 1 else jnp.concatenate(vs, axis=1)

    s = jnp.einsum("bqe,bke->bqk", q, k_cat, preferred_element_type=f32)
    s = s + bias_ref[...].astype(f32)
    m = jnp.max(s, axis=-1, keepdims=True)
    p = jnp.exp(s - m)
    denom = jnp.sum(p, axis=-1, keepdims=True)
    pv = jnp.einsum("bqk,bke->bqe", p, v_cat, preferred_element_type=f32)
    # Exact division: approx reciprocal (bf16-level) is too coarse for the
    # correctness check and costs nothing to avoid at these shapes.
    o = pv / denom

    # Output projection, residual and store hoisted out of any per-batch loop:
    # one (B*lq, E) @ (E, E) push, one add, one store per block.
    o2 = o.reshape(batch * lq, E)
    out = x2 + jnp.dot(o2, wo_ref[...].astype(f32), preferred_element_type=f32)
    out_ref[...] = out.reshape(batch, lq, E).astype(out_ref.dtype)

  # ma_encoding_block(ma_emb, cat[ope_emb, ma_emb], cat[proc_time^T, trans_time])
  attention_block(ma, n_mas, [(ope, n_opes), (None, n_mas)],
                  ma_bias_ref, wqkv_ma_ref, wo_ma_ref, ma_out_ref)

  # veh_encoding_block(veh_emb, ma_emb, MVpair_trans)
  attention_block(veh, n_vehs, [(ma, n_mas)],
                  veh_bias_ref, wqkv_veh_ref, wo_veh_ref, veh_out_ref)

  # job_encoding_block(ope_emb, cat[ma_emb, veh_emb], cat[proc_time, offload_trans])
  attention_block(ope, n_opes, [(ma, n_mas), (veh, n_vehs)],
                  job_bias_ref, wqkv_job_ref, wo_job_ref, ope_out_ref)


# ----------------------------------------------------------------------------
# EncoderLayer_Base.forward_tmp — single pallas_call.
# ----------------------------------------------------------------------------
def encoder_layer_forward(packed_params, ope_emb, ma_emb, veh_emb, proc_time,
                          offload_trans_time, trans_time, MVpair_trans):
  B, n_opes, E = ope_emb.shape
  n_mas = ma_emb.shape[1]
  n_vehs = veh_emb.shape[1]

  # Fold batch into rows for the shared-weight projections (metadata-only
  # reshape for contiguous inputs).
  ope2 = ope_emb.reshape(B * n_opes, E)
  ma2 = ma_emb.reshape(B * n_mas, E)
  veh2 = veh_emb.reshape(B * n_vehs, E)

  # The reference module's torch.cat / transpose glue, done as tiny XLA ops
  # outside the kernel so the kernel pays no in-kernel transposes.
  ma_bias = jnp.concatenate([jnp.swapaxes(proc_time, 1, 2), trans_time], axis=-1)
  veh_bias = MVpair_trans
  job_bias = jnp.concatenate([proc_time, offload_trans_time], axis=-1)

  kernel = functools.partial(_fused_encoder_kernel, batch=B, n_opes=n_opes,
                             n_mas=n_mas, n_vehs=n_vehs)
  out_shape = (
      jax.ShapeDtypeStruct((B, n_opes, E), ope_emb.dtype),
      jax.ShapeDtypeStruct((B, n_mas, E), ma_emb.dtype),
      jax.ShapeDtypeStruct((B, n_vehs, E), veh_emb.dtype),
  )
  # Explicit whole-array VMEM residency for every operand / output.
  vmem = pl.BlockSpec(memory_space=pltpu.MemorySpace.VMEM)

  ope_out, ma_out, veh_out = pl.pallas_call(
      kernel,
      out_shape=out_shape,
      in_specs=[vmem] * 12,
      out_specs=(vmem, vmem, vmem),
  )(ope2, ma2, veh2, ma_bias, veh_bias, job_bias,
    packed_params["ma"]["wqkv"], packed_params["ma"]["wo"],
    packed_params["veh"]["wqkv"], packed_params["veh"]["wo"],
    packed_params["job"]["wqkv"], packed_params["job"]["wo"])
  return ope_out, ma_out, veh_out


# ----------------------------------------------------------------------------
# Parameter init (raw [Wq, Wk, Wv, Wo]) and packing ([Wq*scale|Wk|Wv], Wo).
# ----------------------------------------------------------------------------
def _init_params(key, embedding_dim):
  E = embedding_dim
  params = {}
  for name in ("ma", "veh", "job"):
    key, sub = jax.random.split(key)
    params[name] = (jax.random.normal(sub, (4, E, E), jnp.float32)
                    / math.sqrt(E))
  return params


def pack_params(raw_params, embedding_dim):
  """Pack [Wq|Wk|Wv] into one (E, 3E) slab per block with the attention scale
  folded into the Wq columns at weight-construction time (not per call)."""
  scale = 1.0 / math.sqrt(embedding_dim)
  packed = {}
  for name, w in raw_params.items():
    packed[name] = {
        "wqkv": jnp.concatenate([w[0] * scale, w[1], w[2]], axis=-1),  # (E, 3E)
        "wo": w[3],                                                    # (E, E)
    }
  return packed


# ----------------------------------------------------------------------------
# Pure-JAX reference (same math, no Pallas) for the correctness check.
# ----------------------------------------------------------------------------
def _ref_block(x, kv, bias, w):
  hp = lax.Precision.HIGHEST
  wq, wk, wv, wo = w[0], w[1], w[2], w[3]
  E = x.shape[-1]
  q = jnp.einsum("ble,ef->blf", x, wq, precision=hp)
  k = jnp.einsum("ble,ef->blf", kv, wk, precision=hp)
  v = jnp.einsum("ble,ef->blf", kv, wv, precision=hp)
  s = jnp.einsum("bqe,bke->bqk", q, k, precision=hp) / math.sqrt(E) + bias
  a = jax.nn.softmax(s, axis=-1)
  o = jnp.einsum("bqk,bke->bqe", a, v, precision=hp)
  return x + jnp.einsum("ble,ef->blf", o, wo, precision=hp)


def _ref_forward(raw_params, ope_emb, ma_emb, veh_emb, proc_time,
                 offload_trans_time, trans_time, MVpair_trans):
  proc_trans_time = jnp.concatenate(
      [jnp.swapaxes(proc_time, 1, 2), trans_time], axis=-1)
  ope_ma_emb = jnp.concatenate([ope_emb, ma_emb], axis=1)
  ma_out = _ref_block(ma_emb, ope_ma_emb, proc_trans_time, raw_params["ma"])
  veh_out = _ref_block(veh_emb, ma_emb, MVpair_trans, raw_params["veh"])
  ma_veh = jnp.concatenate([ma_emb, veh_emb], axis=1)
  job_bias = jnp.concatenate([proc_time, offload_trans_time], axis=-1)
  ope_out = _ref_block(ope_emb, ma_veh, job_bias, raw_params["job"])
  return ope_out, ma_out, veh_out


if __name__ == "__main__":
  B, n_opes, n_mas, n_vehs, E = 2, 16, 8, 8, 32

  key = jax.random.PRNGKey(0)
  kp, k1, k2, k3, k4, k5, k6, k7 = jax.random.split(key, 8)

  raw_params = _init_params(kp, E)
  packed_params = pack_params(raw_params, E)

  ope_emb = jax.random.normal(k1, (B, n_opes, E), jnp.float32)
  ma_emb = jax.random.normal(k2, (B, n_mas, E), jnp.float32)
  veh_emb = jax.random.normal(k3, (B, n_vehs, E), jnp.float32)
  proc_time = jax.random.uniform(k4, (B, n_opes, n_mas), jnp.float32)
  offload_trans_time = jax.random.uniform(k5, (B, n_opes, n_vehs), jnp.float32)
  trans_time = jax.random.uniform(k6, (B, n_mas, n_mas), jnp.float32)
  MVpair_trans = jax.random.uniform(k7, (B, n_vehs, n_mas), jnp.float32)

  fwd = jax.jit(encoder_layer_forward)
  outs = fwd(packed_params, ope_emb, ma_emb, veh_emb, proc_time,
             offload_trans_time, trans_time, MVpair_trans)
  outs = jax.block_until_ready(outs)

  refs = _ref_forward(raw_params, ope_emb, ma_emb, veh_emb, proc_time,
                      offload_trans_time, trans_time, MVpair_trans)
  # f32 everywhere with exact softmax division; 2e-3 only covers the MXU's
  # f32-emulation rounding on hardware (interpret mode matches to ~1e-6).
  for o, r in zip(outs, refs):
    assert o.shape == r.shape
    assert jnp.allclose(o, r, rtol=2e-3, atol=2e-3), "mismatch vs reference"

  print("KERNEL_OK")
</pallas_src>

<mosaic_0001>
module attributes {stable_mosaic.version = 11 : i64} {
  func.func @_fused_encoder_kernel(%arg0: memref<32x32xf32, #tpu.memory_space<vmem>>, %arg1: memref<16x32xf32, #tpu.memory_space<vmem>>, %arg2: memref<16x32xf32, #tpu.memory_space<vmem>>, %arg3: memref<2x8x24xf32, #tpu.memory_space<vmem>>, %arg4: memref<2x8x8xf32, #tpu.memory_space<vmem>>, %arg5: memref<2x16x16xf32, #tpu.memory_space<vmem>>, %arg6: memref<32x96xf32, #tpu.memory_space<vmem>>, %arg7: memref<32x32xf32, #tpu.memory_space<vmem>>, %arg8: memref<32x96xf32, #tpu.memory_space<vmem>>, %arg9: memref<32x32xf32, #tpu.memory_space<vmem>>, %arg10: memref<32x96xf32, #tpu.memory_space<vmem>>, %arg11: memref<32x32xf32, #tpu.memory_space<vmem>>, %arg12: memref<2x16x32xf32, #tpu.memory_space<vmem>>, %arg13: memref<2x8x32xf32, #tpu.memory_space<vmem>>, %arg14: memref<2x8x32xf32, #tpu.memory_space<vmem>>) attributes {dimension_semantics = [], scalar_prefetch = 0 : i64, scratch_operands = 0 : i64, tpu.core_type = #tpu.core_type<tc>} {
    %c0 = arith.constant 0 : index
    %c0_0 = arith.constant 0 : index
    %0 = vector.load %arg0[%c0, %c0_0] : memref<32x32xf32, #tpu.memory_space<vmem>>, vector<32x32xf32>
    %c0_1 = arith.constant 0 : index
    %c0_2 = arith.constant 0 : index
    %1 = vector.load %arg1[%c0_1, %c0_2] : memref<16x32xf32, #tpu.memory_space<vmem>>, vector<16x32xf32>
    %c0_3 = arith.constant 0 : index
    %c0_4 = arith.constant 0 : index
    %2 = vector.load %arg2[%c0_3, %c0_4] : memref<16x32xf32, #tpu.memory_space<vmem>>, vector<16x32xf32>
    %c0_5 = arith.constant 0 : index
    %c0_6 = arith.constant 0 : index
    %3 = vector.load %arg6[%c0_5, %c0_6] : memref<32x96xf32, #tpu.memory_space<vmem>>, vector<32x96xf32>
    %cst = arith.constant dense<0.000000e+00> : vector<16x96xf32>
    %4 = tpu.matmul %1, %3, %cst {dimension_numbers = #tpu.dot_dimension_numbers<[1], [0], [0], [1], [0, 0, 1, 1], [], []>} : vector<16x32xf32>, vector<32x96xf32>, vector<16x96xf32> -> vector<16x96xf32>
    %5 = vector.extract_strided_slice %4 {offsets = [0, 0], sizes = [16, 32], strides = [1, 1]} : vector<16x96xf32> to vector<16x32xf32>
    %6 = vector.shape_cast %5 : vector<16x32xf32> to vector<2x8x32xf32>
    %7 = vector.extract_strided_slice %3 {offsets = [0, 32], sizes = [32, 64], strides = [1, 1]} : vector<32x96xf32> to vector<32x64xf32>
    %cst_7 = arith.constant dense<0.000000e+00> : vector<32x64xf32>
    %8 = tpu.matmul %0, %7, %cst_7 {dimension_numbers = #tpu.dot_dimension_numbers<[1], [0], [0], [1], [0, 0, 1, 1], [], []>} : vector<32x32xf32>, vector<32x64xf32>, vector<32x64xf32> -> vector<32x64xf32>
    %9 = vector.extract_strided_slice %8 {offsets = [0, 0], sizes = [32, 32], strides = [1, 1]} : vector<32x64xf32> to vector<32x32xf32>
    %10 = vector.shape_cast %9 : vector<32x32xf32> to vector<2x16x32xf32>
    %11 = vector.extract_strided_slice %8 {offsets = [0, 32], sizes = [32, 32], strides = [1, 1]} : vector<32x64xf32> to vector<32x32xf32>
    %12 = vector.shape_cast %11 : vector<32x32xf32> to vector<2x16x32xf32>
    %13 = vector.extract_strided_slice %4 {offsets = [0, 32], sizes = [16, 32], strides = [1, 1]} : vector<16x96xf32> to vector<16x32xf32>
    %14 = vector.shape_cast %13 : vector<16x32xf32> to vector<2x8x32xf32>
    %15 = vector.extract_strided_slice %4 {offsets = [0, 64], sizes = [16, 32], strides = [1, 1]} : vector<16x96xf32> to vector<16x32xf32>
    %16 = vector.shape_cast %15 : vector<16x32xf32> to vector<2x8x32xf32>
    %17 = tpu.concatenate %10, %14 in 1 : vector<2x16x32xf32>, vector<2x8x32xf32> -> vector<2x24x32xf32>
    %18 = tpu.concatenate %12, %16 in 1 : vector<2x16x32xf32>, vector<2x8x32xf32> -> vector<2x24x32xf32>
    "tpu.trace_start"() <{level = 10 : i32, message = "bqe,bke->bqk"}> : () -> ()
    %cst_8 = arith.constant dense<0.000000e+00> : vector<2x8x24xf32>
    %19 = tpu.matmul %6, %17, %cst_8 {dimension_numbers = #tpu.dot_dimension_numbers<[2], [2], [1], [1], [0, 0, 0, 1, 1, 1], [0], [0]>} : vector<2x8x32xf32>, vector<2x24x32xf32>, vector<2x8x24xf32> -> vector<2x8x24xf32>
    "tpu.trace_stop"() : () -> ()
    %c0_9 = arith.constant 0 : index
    %c0_10 = arith.constant 0 : index
    %c0_11 = arith.constant 0 : index
    %20 = vector.load %arg3[%c0_9, %c0_10, %c0_11] : memref<2x8x24xf32, #tpu.memory_space<vmem>>, vector<2x8x24xf32>
    %21 = arith.addf %19, %20 : vector<2x8x24xf32>
    %cst_12 = arith.constant dense<0xFF800000> : vector<2x8xf32>
    %22 = vector.multi_reduction <maximumf>, %21, %cst_12 [2] : vector<2x8x24xf32> to vector<2x8xf32>
    %23 = vector.shape_cast %22 : vector<2x8xf32> to vector<2x8x1xf32>
    %24 = vector.broadcast %23 : vector<2x8x1xf32> to vector<2x8x24xf32>
    %25 = arith.subf %21, %24 : vector<2x8x24xf32>
    %26 = math.exp %25 : vector<2x8x24xf32>
    %cst_13 = arith.constant dense<0.000000e+00> : vector<2x8xf32>
    %27 = vector.multi_reduction <add>, %26, %cst_13 [2] : vector<2x8x24xf32> to vector<2x8xf32>
    %28 = vector.shape_cast %27 : vector<2x8xf32> to vector<2x8x1xf32>
    "tpu.trace_start"() <{level = 10 : i32, message = "bqk,bke->bqe"}> : () -> ()
    %cst_14 = arith.constant dense<0.000000e+00> : vector<2x8x32xf32>
    %29 = tpu.matmul %26, %18, %cst_14 {dimension_numbers = #tpu.dot_dimension_numbers<[2], [1], [1], [2], [0, 0, 0, 1, 1, 2], [0], [0]>} : vector<2x8x24xf32>, vector<2x24x32xf32>, vector<2x8x32xf32> -> vector<2x8x32xf32>
    "tpu.trace_stop"() : () -> ()
    %30 = vector.broadcast %28 : vector<2x8x1xf32> to vector<2x8x32xf32>
    %31 = arith.divf %29, %30 : vector<2x8x32xf32>
    %32 = vector.shape_cast %31 : vector<2x8x32xf32> to vector<16x32xf32>
    %c0_15 = arith.constant 0 : index
    %c0_16 = arith.constant 0 : index
    %33 = vector.load %arg7[%c0_15, %c0_16] : memref<32x32xf32, #tpu.memory_space<vmem>>, vector<32x32xf32>
    %cst_17 = arith.constant dense<0.000000e+00> : vector<16x32xf32>
    %34 = tpu.matmul %32, %33, %cst_17 {dimension_numbers = #tpu.dot_dimension_numbers<[1], [0], [0], [1], [0, 0, 1, 1], [], []>} : vector<16x32xf32>, vector<32x32xf32>, vector<16x32xf32> -> vector<16x32xf32>
    %35 = arith.addf %1, %34 : vector<16x32xf32>
    %36 = vector.shape_cast %35 : vector<16x32xf32> to vector<2x8x32xf32>
    %c0_18 = arith.constant 0 : index
    %c0_19 = arith.constant 0 : index
    %c0_20 = arith.constant 0 : index
    %37 = vector.load %arg13[%c0_18, %c0_19, %c0_20] : memref<2x8x32xf32, #tpu.memory_space<vmem>>, vector<2x8x32xf32>
    tpu.vector_store %arg13[%c0_18, %c0_19, %c0_20], %36 {strides = array<i32>} : memref<2x8x32xf32, #tpu.memory_space<vmem>>, vector<2x8x32xf32>,
    %c0_21 = arith.constant 0 : index
    %c0_22 = arith.constant 0 : index
    %38 = vector.load %arg8[%c0_21, %c0_22] : memref<32x96xf32, #tpu.memory_space<vmem>>, vector<32x96xf32>
    %cst_23 = arith.constant dense<0.000000e+00> : vector<16x96xf32>
    %39 = tpu.matmul %2, %38, %cst_23 {dimension_numbers = #tpu.dot_dimension_numbers<[1], [0], [0], [1], [0, 0, 1, 1], [], []>} : vector<16x32xf32>, vector<32x96xf32>, vector<16x96xf32> -> vector<16x96xf32>
    %40 = vector.extract_strided_slice %39 {offsets = [0, 0], sizes = [16, 32], strides = [1, 1]} : vector<16x96xf32> to vector<16x32xf32>
    %41 = vector.shape_cast %40 : vector<16x32xf32> to vector<2x8x32xf32>
    %42 = vector.extract_strided_slice %38 {offsets = [0, 32], sizes = [32, 64], strides = [1, 1]} : vector<32x96xf32> to vector<32x64xf32>
    %cst_24 = arith.constant dense<0.000000e+00> : vector<16x64xf32>
    %43 = tpu.matmul %1, %42, %cst_24 {dimension_numbers = #tpu.dot_dimension_numbers<[1], [0], [0], [1], [0, 0, 1, 1], [], []>} : vector<16x32xf32>, vector<32x64xf32>, vector<16x64xf32> -> vector<16x64xf32>
    %44 = vector.extract_strided_slice %43 {offsets = [0, 0], sizes = [16, 32], strides = [1, 1]} : vector<16x64xf32> to vector<16x32xf32>
    %45 = vector.shape_cast %44 : vector<16x32xf32> to vector<2x8x32xf32>
    %46 = vector.extract_strided_slice %43 {offsets = [0, 32], sizes = [16, 32], strides = [1, 1]} : vector<16x64xf32> to vector<16x32xf32>
    %47 = vector.shape_cast %46 : vector<16x32xf32> to vector<2x8x32xf32>
    "tpu.trace_start"() <{level = 10 : i32, message = "bqe,bke->bqk"}> : () -> ()
    %cst_25 = arith.constant dense<0.000000e+00> : vector<2x8x8xf32>
    %48 = tpu.matmul %41, %45, %cst_25 {dimension_numbers = #tpu.dot_dimension_numbers<[2], [2], [1], [1], [0, 0, 0, 1, 1, 1], [0], [0]>} : vector<2x8x32xf32>, vector<2x8x32xf32>, vector<2x8x8xf32> -> vector<2x8x8xf32>
    "tpu.trace_stop"() : () -> ()
    %c0_26 = arith.constant 0 : index
    %c0_27 = arith.constant 0 : index
    %c0_28 = arith.constant 0 : index
    %49 = vector.load %arg4[%c0_26, %c0_27, %c0_28] : memref<2x8x8xf32, #tpu.memory_space<vmem>>, vector<2x8x8xf32>
    %50 = arith.addf %48, %49 : vector<2x8x8xf32>
    %cst_29 = arith.constant dense<0xFF800000> : vector<2x8xf32>
    %51 = vector.multi_reduction <maximumf>, %50, %cst_29 [2] : vector<2x8x8xf32> to vector<2x8xf32>
    %52 = vector.shape_cast %51 : vector<2x8xf32> to vector<2x8x1xf32>
    %53 = vector.broadcast %52 : vector<2x8x1xf32> to vector<2x8x8xf32>
    %54 = arith.subf %50, %53 : vector<2x8x8xf32>
    %55 = math.exp %54 : vector<2x8x8xf32>
    %cst_30 = arith.constant dense<0.000000e+00> : vector<2x8xf32>
    %56 = vector.multi_reduction <add>, %55, %cst_30 [2] : vector<2x8x8xf32> to vector<2x8xf32>
    %57 = vector.shape_cast %56 : vector<2x8xf32> to vector<2x8x1xf32>
    "tpu.trace_start"() <{level = 10 : i32, message = "bqk,bke->bqe"}> : () -> ()
    %cst_31 = arith.constant dense<0.000000e+00> : vector<2x8x32xf32>
    %58 = tpu.matmul %55, %47, %cst_31 {dimension_numbers = #tpu.dot_dimension_numbers<[2], [1], [1], [2], [0, 0, 0, 1, 1, 2], [0], [0]>} : vector<2x8x8xf32>, vector<2x8x32xf32>, vector<2x8x32xf32> -> vector<2x8x32xf32>
    "tpu.trace_stop"() : () -> ()
    %59 = vector.broadcast %57 : vector<2x8x1xf32> to vector<2x8x32xf32>
    %60 = arith.divf %58, %59 : vector<2x8x32xf32>
    %61 = vector.shape_cast %60 : vector<2x8x32xf32> to vector<16x32xf32>
    %c0_32 = arith.constant 0 : index
    %c0_33 = arith.constant 0 : index
    %62 = vector.load %arg9[%c0_32, %c0_33] : memref<32x32xf32, #tpu.memory_space<vmem>>, vector<32x32xf32>
    %cst_34 = arith.constant dense<0.000000e+00> : vector<16x32xf32>
    %63 = tpu.matmul %61, %62, %cst_34 {dimension_numbers = #tpu.dot_dimension_numbers<[1], [0], [0], [1], [0, 0, 1, 1], [], []>} : vector<16x32xf32>, vector<32x32xf32>, vector<16x32xf32> -> vector<16x32xf32>
    %64 = arith.addf %2, %63 : vector<16x32xf32>
    %65 = vector.shape_cast %64 : vector<16x32xf32> to vector<2x8x32xf32>
    %c0_35 = arith.constant 0 : index
    %c0_36 = arith.constant 0 : index
    %c0_37 = arith.constant 0 : index
    %66 = vector.load %arg14[%c0_35, %c0_36, %c0_37] : memref<2x8x32xf32, #tpu.memory_space<vmem>>, vector<2x8x32xf32>
    tpu.vector_store %arg14[%c0_35, %c0_36, %c0_37], %65 {strides = array<i32>} : memref<2x8x32xf32, #tpu.memory_space<vmem>>, vector<2x8x32xf32>,
    %c0_38 = arith.constant 0 : index
    %c0_39 = arith.constant 0 : index
    %67 = vector.load %arg10[%c0_38, %c0_39] : memref<32x96xf32, #tpu.memory_space<vmem>>, vector<32x96xf32>
    %cst_40 = arith.constant dense<0.000000e+00> : vector<32x96xf32>
    %68 = tpu.matmul %0, %67, %cst_40 {dimension_numbers = #tpu.dot_dimension_numbers<[1], [0], [0], [1], [0, 0, 1, 1], [], []>} : vector<32x32xf32>, vector<32x96xf32>, vector<32x96xf32> -> vector<32x96xf32>
    %69 = vector.extract_strided_slice %68 {offsets = [0, 0], sizes = [32, 32], strides = [1, 1]} : vector<32x96xf32> to vector<32x32xf32>
    %70 = vector.shape_cast %69 : vector<32x32xf32> to vector<2x16x32xf32>
    %71 = vector.extract_strided_slice %67 {offsets = [0, 32], sizes = [32, 64], strides = [1, 1]} : vector<32x96xf32> to vector<32x64xf32>
    %cst_41 = arith.constant dense<0.000000e+00> : vector<16x64xf32>
    %72 = tpu.matmul %1, %71, %cst_41 {dimension_numbers = #tpu.dot_dimension_numbers<[1], [0], [0], [1], [0, 0, 1, 1], [], []>} : vector<16x32xf32>, vector<32x64xf32>, vector<16x64xf32> -> vector<16x64xf32>
    %73 = vector.extract_strided_slice %72 {offsets = [0, 0], sizes = [16, 32], strides = [1, 1]} : vector<16x64xf32> to vector<16x32xf32>
    %74 = vector.shape_cast %73 : vector<16x32xf32> to vector<2x8x32xf32>
    %75 = vector.extract_strided_slice %72 {offsets = [0, 32], sizes = [16, 32], strides = [1, 1]} : vector<16x64xf32> to vector<16x32xf32>
    %76 = vector.shape_cast %75 : vector<16x32xf32> to vector<2x8x32xf32>
    %77 = vector.extract_strided_slice %67 {offsets = [0, 32], sizes = [32, 64], strides = [1, 1]} : vector<32x96xf32> to vector<32x64xf32>
    %cst_42 = arith.constant dense<0.000000e+00> : vector<16x64xf32>
    %78 = tpu.matmul %2, %77, %cst_42 {dimension_numbers = #tpu.dot_dimension_numbers<[1], [0], [0], [1], [0, 0, 1, 1], [], []>} : vector<16x32xf32>, vector<32x64xf32>, vector<16x64xf32> -> vector<16x64xf32>
    %79 = vector.extract_strided_slice %78 {offsets = [0, 0], sizes = [16, 32], strides = [1, 1]} : vector<16x64xf32> to vector<16x32xf32>
    %80 = vector.shape_cast %79 : vector<16x32xf32> to vector<2x8x32xf32>
    %81 = vector.extract_strided_slice %78 {offsets = [0, 32], sizes = [16, 32], strides = [1, 1]} : vector<16x64xf32> to vector<16x32xf32>
    %82 = vector.shape_cast %81 : vector<16x32xf32> to vector<2x8x32xf32>
    %83 = tpu.concatenate %74, %80 in 1 : vector<2x8x32xf32>, vector<2x8x32xf32> -> vector<2x16x32xf32>
    %84 = tpu.concatenate %76, %82 in 1 : vector<2x8x32xf32>, vector<2x8x32xf32> -> vector<2x16x32xf32>
    "tpu.trace_start"() <{level = 10 : i32, message = "bqe,bke->bqk"}> : () -> ()
    %cst_43 = arith.constant dense<0.000000e+00> : vector<2x16x16xf32>
    %85 = tpu.matmul %70, %83, %cst_43 {dimension_numbers = #tpu.dot_dimension_numbers<[2], [2], [1], [1], [0, 0, 0, 1, 1, 1], [0], [0]>} : vector<2x16x32xf32>, vector<2x16x32xf32>, vector<2x16x16xf32> -> vector<2x16x16xf32>
    "tpu.trace_stop"() : () -> ()
    %c0_44 = arith.constant 0 : index
    %c0_45 = arith.constant 0 : index
    %c0_46 = arith.constant 0 : index
    %86 = vector.load %arg5[%c0_44, %c0_45, %c0_46] : memref<2x16x16xf32, #tpu.memory_space<vmem>>, vector<2x16x16xf32>
    %87 = arith.addf %85, %86 : vector<2x16x16xf32>
    %cst_47 = arith.constant dense<0xFF800000> : vector<2x16xf32>
    %88 = vector.multi_reduction <maximumf>, %87, %cst_47 [2] : vector<2x16x16xf32> to vector<2x16xf32>
    %89 = vector.shape_cast %88 : vector<2x16xf32> to vector<2x16x1xf32>
    %90 = vector.broadcast %89 : vector<2x16x1xf32> to vector<2x16x16xf32>
    %91 = arith.subf %87, %90 : vector<2x16x16xf32>
    %92 = math.exp %91 : vector<2x16x16xf32>
    %cst_48 = arith.constant dense<0.000000e+00> : vector<2x16xf32>
    %93 = vector.multi_reduction <add>, %92, %cst_48 [2] : vector<2x16x16xf32> to vector<2x16xf32>
    %94 = vector.shape_cast %93 : vector<2x16xf32> to vector<2x16x1xf32>
    "tpu.trace_start"() <{level = 10 : i32, message = "bqk,bke->bqe"}> : () -> ()
    %cst_49 = arith.constant dense<0.000000e+00> : vector<2x16x32xf32>
    %95 = tpu.matmul %92, %84, %cst_49 {dimension_numbers = #tpu.dot_dimension_numbers<[2], [1], [1], [2], [0, 0, 0, 1, 1, 2], [0], [0]>} : vector<2x16x16xf32>, vector<2x16x32xf32>, vector<2x16x32xf32> -> vector<2x16x32xf32>
    "tpu.trace_stop"() : () -> ()
    %96 = vector.broadcast %94 : vector<2x16x1xf32> to vector<2x16x32xf32>
    %97 = arith.divf %95, %96 : vector<2x16x32xf32>
    %98 = vector.shape_cast %97 : vector<2x16x32xf32> to vector<32x32xf32>
    %c0_50 = arith.constant 0 : index
    %c0_51 = arith.constant 0 : index
    %99 = vector.load %arg11[%c0_50, %c0_51] : memref<32x32xf32, #tpu.memory_space<vmem>>, vector<32x32xf32>
    %cst_52 = arith.constant dense<0.000000e+00> : vector<32x32xf32>
    %100 = tpu.matmul %98, %99, %cst_52 {dimension_numbers = #tpu.dot_dimension_numbers<[1], [0], [0], [1], [0, 0, 1, 1], [], []>} : vector<32x32xf32>, vector<32x32xf32>, vector<32x32xf32> -> vector<32x32xf32>
    %101 = arith.addf %0, %100 : vector<32x32xf32>
    %102 = vector.shape_cast %101 : vector<32x32xf32> to vector<2x16x32xf32>
    %c0_53 = arith.constant 0 : index
    %c0_54 = arith.constant 0 : index
    %c0_55 = arith.constant 0 : index
    %103 = vector.load %arg12[%c0_53, %c0_54, %c0_55] : memref<2x16x32xf32, #tpu.memory_space<vmem>>, vector<2x16x32xf32>
    tpu.vector_store %arg12[%c0_53, %c0_54, %c0_55], %102 {strides = array<i32>} : memref<2x16x32xf32, #tpu.memory_space<vmem>>, vector<2x16x32xf32>,
    return
  }
}

</mosaic_0001>

<bundles_post_ra>
// kernel: encoder_layer_forward.1
= control target key start
LH: loop header
LB: loop body
LE: loop exit
PB: predicated region body
PF: predicated region fallthrough
CT: control target
= control target key end

     0   :  { %20 = vsyncpa [#allocation3], 0  ;;  %s1783_s0 = inlined_call_operand.vmem [shape: f32[32,32], index: 0, kind: input, shape index: {}]   ;;  %s1784_s1 = inlined_call_operand.vmem [shape: f32[16,32], index: 1, kind: input, shape index: {}]   ;;  %s1785_s2 = inlined_call_operand.hbm [shape: f32[16,32], index: 2, kind: input, shape index: {}]   ;;  %s1786_s3 = inlined_call_operand.vmem [shape: f32[2,8,24], index: 3, kind: input, shape index: {}]   ;;  %s1787_s4 = inlined_call_operand.hbm [shape: f32[2,8,8], index: 4, kind: input, shape index: {}]   ;;  %s1788_s5 = inlined_call_operand.vmem [shape: f32[2,16,16], index: 5, kind: input, shape index: {}]   ;;  %s1789_s6 = inlined_call_operand.vmem [shape: f32[32,96], index: 6, kind: input, shape index: {}]   ;;  %s1790_s7 = inlined_call_operand.vmem [shape: f32[32,32], index: 7, kind: input, shape index: {}]   ;;  %s1791_s8 = inlined_call_operand.vmem [shape: f32[32,96], index: 8, kind: input, shape index: {}]   ;;  %s1792_s9 = inlined_call_operand.vmem [shape: f32[32,32], index: 9, kind: input, shape index: {}]   ;;  %s1793_s10 = inlined_call_operand.vmem [shape: f32[32,96], index: 10, kind: input, shape index: {}]   ;;  %s1794_s11 = inlined_call_operand.hbm [shape: f32[32,32], index: 11, kind: input, shape index: {}]   ;;  %s1795_s12 = inlined_call_operand.hbm [shape: f32[2,16,32], index: 12, kind: output, shape index: {0}]   ;;  %s1796_s13 = inlined_call_operand.hbm [shape: f32[2,8,32], index: 13, kind: output, shape index: {1}]   ;;  %s1797_s14 = inlined_call_operand.hbm [shape: f32[2,8,32], index: 14, kind: output, shape index: {2}]  }
   0x1   :  { %21 = vsyncpa [#allocation6], 0 }
   0x2   :  { %22 = vsyncpa [#allocation4], 0 }
   0x3   :  { %23 = vsyncpa [#allocation10], 0  ;;  %s47_s15 = sshll.u32 %s1787_s4, 4  ;;  %s1433_s16 = smov [#allocation5]   ;;  %s48_s15 = int_to_ptr.hbm [resolvable:$true] %s47_s15 }
   0x4   :  { %s49_s17 = sshll.u32 %s1433_s16, 4  ;;  %s32_s20 = sshll.u32 %s1785_s2, 4  ;;  %s50_s17 = int_to_ptr.vmem [resolvable:$true] %s49_s17  ;;  %s33_s20 = int_to_ptr.hbm [resolvable:$true] %s32_s20 }
   0x5   :  { %s1434_s21 = smov 128   ;;  %s1435_s22 = smov 8  }
   0x6   :  { %55 = dma.hbm_to_vmem [thread:$0]  %s48_s15, 256, %s50_s17, [#allocation6], %s1434_s21, %s1434_s21, %s1435_s22  }
   0x7   :  { %s1436_s23 = smov [#allocation2]   ;;  %s72_s4 = sshll.u32 %s1794_s11, 4  ;;  %s73_s4 = int_to_ptr.hbm [resolvable:$true] %s72_s4 }
   0x8   :  { %s34_s24 = sshll.u32 %s1436_s23, 4  ;;  %s1437_s2 = smov [#allocation7]   ;;  %s35_s24 = int_to_ptr.vmem [resolvable:$true] %s34_s24 }
   0x9   :  { %40 = dma.hbm_to_vmem [thread:$0]  %s33_s20, 256, %s35_s24, [#allocation3], %s1434_s21, %s1434_s21, %s1435_s22  }
   0xa   :  { %s74_s27 = sshll.u32 %s1437_s2, 4  ;;  %s75_s27 = int_to_ptr.vmem [resolvable:$true] %s74_s27 }
   0xb   :  { %80 = dma.hbm_to_vmem [thread:$0]  %s73_s4, 512, %s75_s27, [#allocation6], %s1434_s21, %s1434_s21, %s1435_s22  }
   0xc   :  { %1425 = dma.done.wait [#allocation3], 256  }
   0xd   :  { %1426 = vsyncadd [#allocation3], 4294967040 }
   0xe   :  { %1427 = dma.done.wait [#allocation6], 768  }
   0xf   :  { %1428 = vsyncadd [#allocation6], 4294966528  ;;  %v104_v0 = vld [vmem:[%s1789_s6 + $0x18] sm:$0xff]  ;;  %v103_v1 = vld [vmem:[%s1789_s6 + $0x10] sm:$0xff]  ;;  %s1438_s17 = smov 96   ;;  %vm105_vm0 = vcmask 261120  }
  0x10   :  { %124 = vmatpush.msra.mxu0 %v104_v0  ;;  %1172 = vmatpush.msra.mxu3 %v104_v0  ;;  %v1189_v2 = vpack.i.bf16 %v103_v1, %v104_v0  ;;  %v102_v3 = vld [vmem:[%s1789_s6 + $0x8] sm:$0xff]  ;;  %v101_v4 = vld [vmem:[%s1789_s6] sm:$0xff]  ;;  %v1571_v15 = vld [vmem:[%s1783_s0 + $0x10] sm:$0xff]  ;;  %vm260_vm1 = vcmask 195584   ;;  %vm536_vm10 = vcmask 64512   ;;  %s1440_s11 = smov [#allocation11]  }
  0x11   :  { %v1551_v5 = vld [vmem:[%s1784_s1] sm:$0xff]  ;;  %v1556_v6 = vld [vmem:[%s1784_s1 + $0x8] sm:$0xff]  ;;  %v1194_v7 = vpack.i.bf16 %v101_v4, %v102_v3  ;;  %v1586_v18 = vld [vmem:[%s1783_s0 + $0x18] sm:$0xff]  ;;  %s1093_s30 = sshll.u32 %s1440_s11, 4  ;;  %s1095_s18 = sshll.u32 %s1797_s14, 4  ;;  %s1094_s30 = int_to_ptr.vmem [resolvable:$true] %s1093_s30  ;;  %s1096_s18 = int_to_ptr.hbm [resolvable:$true] %s1095_s18 }
  0x12   :  { %1190 = vrot.lane.b32.xlu0 %v1189_v2, %s1438_s17  ;;  %125 = vmatpush.msra.mxu0 %v103_v1  ;;  %v1566_v14 = vld [vmem:[%s1783_s0] sm:$0xff]  ;;  %v1581_v17 = vld [vmem:[%s1783_s0 + $0x8] sm:$0xff]  ;;  %v412_v32 = vld [vmem:[%s1791_s8 + $0x10] sm:$0xff]  ;;  %s1082_s0 = sshll.u32 %s1796_s13, 4  ;;  %s1441_s13 = smov [#allocation8]   ;;  %s1083_s0 = int_to_ptr.hbm [resolvable:$true] %s1082_s0 }
  0x13   :  { %1173 = vmatpush.msra.mxu3 %v103_v1  ;;  %v413_v33 = vld [vmem:[%s1791_s8 + $0x18] sm:$0xff]  ;;  %v410_v34 = vld [vmem:[%s1791_s8] sm:$0xff]  ;;  %v411_v37 = vld [vmem:[%s1791_s8 + $0x8] sm:$0xff]  ;;  %s1067_s14 = sshll.u32 %s1441_s13, 4  ;;  %s1069_s20 = sshll.u32 %s1795_s12, 4  ;;  %s1068_s14 = int_to_ptr.vmem [resolvable:$true] %s1067_s14  ;;  %s1070_s20 = int_to_ptr.hbm [resolvable:$true] %s1069_s20 }
  0x14   :  { %126 = vmatpush.msra.mxu0 %v102_v3  ;;  %v1214_v36 = vpack.i.bf16 %v412_v32, %v413_v33  ;;  %v1219_v38 = vpack.i.bf16 %v410_v34, %v411_v37  ;;  %v198_v40 = vld [vmem:[%s1786_s3] sm:$0xff]  ;;  %v199_v44 = vld [vmem:[%s1786_s3 + $0x8] sm:$0xff] }
  0x15   :  { %1174 = vmatpush.msra.mxu3 %v102_v3  ;;  %v1628_v60 = vld [vmem:[#allocation2] sm:$0xff] }
  0x16   :  { %127 = vmatpush.msra.mxu0 %v101_v4 }
  0x17   :  { %1118 = vmatmul.msk.f32.vlgmr.msra.gmra.mxu0 %vm105_vm0, %v1551_v5  ;;  %1175 = vmatpush.msra.mxu3 %v101_v4 }
  0x18   :  { %1119 = vmatmul.msk.f32.vlgmr.msra.gmra.mxu3 %vm105_vm0, %v1556_v6 }
  0x1a   :  { %1195 = vrot.lane.b32.xlu0 %v1194_v7, %s1438_s17  ;;  %v1634_v7 = vld [vmem:[#allocation2 + $0x8] sm:$0xff] }
  0x84   :  { %v1191_v8 = vpop.permute.xlu0 %1190 }
  0x85   :  { %v1192_v9 = vunpack.i.l.bf16 %v1191_v8  ;;  %v1193_v10 = vunpack.i.h.bf16 %v1191_v8  ;;  %v376_v8 = vld [vmem:[%s1790_s7 + $0x18] sm:$0xff] }
  0x86   :  { %395 = vmatpush.msrb.mxu0 %v376_v8 }
  0x87   :  { %175 = vmatpush.msra.mxu1 %v1192_v9  ;;  %1176 = vmatpush.msra.mxu2 %v1192_v9  ;;  %v375_v9 = vld [vmem:[%s1790_s7 + $0x10] sm:$0xff] }
  0x88   :  { %396 = vmatpush.msrb.mxu0 %v375_v9 }
  0x89   :  { %176 = vmatpush.msra.mxu1 %v1193_v10  ;;  %1177 = vmatpush.msra.mxu2 %v1193_v10  ;;  %v374_v10 = vld [vmem:[%s1790_s7 + $0x8] sm:$0xff] }
  0x8a   :  { %397 = vmatpush.msrb.mxu0 %v374_v10 }
  0x8c   :  { %v1196_v11 = vpop.permute.xlu0 %1195 }
  0x8d   :  { %v1197_v12 = vunpack.i.l.bf16 %v1196_v11  ;;  %v1198_v13 = vunpack.i.h.bf16 %v1196_v11  ;;  %v373_v11 = vld [vmem:[%s1790_s7] sm:$0xff] }
  0x8e   :  { %398 = vmatpush.msrb.mxu0 %v373_v11 }
  0x8f   :  { %177 = vmatpush.msra.mxu1 %v1197_v12  ;;  %1178 = vmatpush.msra.mxu2 %v1197_v12 }
  0x91   :  { %178 = vmatpush.msra.mxu1 %v1198_v13  ;;  %1179 = vmatpush.msra.mxu2 %v1198_v13 }
  0x92   :  { %1120 = vmatmul.msk.f32.vlgmr.msra.gmra.mxu1 %vm105_vm0, %v1566_v14  ;;  %1122 = vmatmul.msk.f32.vlgmr.msra.gmra.mxu2 %vm105_vm0, %v1571_v15 }
  0x94   :  { %v129_v16 = vpop.f32.mrf.mxu0 }
  0x95   :  { %194 = vrot.lane.b32.xlu1 %v129_v16, %s1438_s17 }
  0x9a   :  { %1121 = vmatmul.msk.f32.gmra.mxu1 %vm105_vm0, %v1581_v17  ;;  %1123 = vmatmul.msk.f32.gmra.mxu2 %vm105_vm0, %v1586_v18 }
  0x9b   :  { %v132_v19 = vpop.f32.mrf.mxu3 }
  0x9d   :  { %196 = vrot.lane.b32.xlu1 %v132_v19, %s1438_s17 }
 0x107   :  { %v195_v20 = vpop.permute.xlu1 %194 }
 0x108   :  { %1124 = vmatpush.xpose.msk.msrb.mxu2 %vm105_vm0, %v195_v20 }
 0x10f   :  { %v197_v21 = vpop.permute.xlu1 %196  ;;  %v180_v22 = vpop.f32.mrf.mxu1 }
 0x110   :  { %v1199_v23 = vpack.i.bf16 %v180_v22, %v197_v21  ;;  %1128 = vmatpush.xpose.msk.msrb.mxu3 %vm105_vm0, %v197_v21 }
 0x112   :  { %1200 = vrot.lane.b32.xlu1 %v1199_v23, %s1438_s17 }
 0x115   :  { %v186_v24 = vpop.f32.mrf.mxu2 }
 0x117   :  { %v183_v25 = vpop.f32.mrf.mxu1 }
 0x118   :  { %v1204_v26 = vpack.i.bf16 %v183_v25, %v195_v20  ;;  %1125 = vmatpush.xpose.msk.msrb.mxu2 %vm105_vm0, %v183_v25 }
 0x11a   :  { %1205 = vrot.lane.b32.xlu0 %v1204_v26, %s1438_s17  ;;  %1220 = vrot.lane.b32.xlu1 %v1219_v38, %s1438_s17 }
 0x11c   :  { %1126 = vmatpush.xpose.msk.msrb.mxu2 %vm105_vm0, %v180_v22 }
 0x11d   :  { %v189_v27 = vpop.f32.mrf.mxu2 }
 0x11e   :  { %1129 = vmatpush.xpose.msk.msrb.mxu3 %vm105_vm0, %v189_v27  ;;  %v1209_v48 = vpack.i.bf16 %v186_v24, %v189_v27 }
 0x11f   :  { %1127 = vmatmul.msk.f32.vlgmr.msrb.gmra.mxu2 %vm105_vm0, %v129_v16 }
 0x122   :  { %1130 = vmatpush.xpose.msk.msrb.mxu3 %vm105_vm0, %v186_v24  ;;  %1215 = vrot.lane.b32.xlu0 %v1214_v36, %s1438_s17 }
 0x125   :  { %1131 = vmatmul.msk.f32.vlgmr.msrb.gmra.mxu3 %vm105_vm0, %v132_v19 }
 0x184   :  { %v1201_v28 = vpop.permute.xlu1 %1200 }
 0x185   :  { %v1202_v29 = vunpack.i.l.bf16 %v1201_v28  ;;  %v1203_v39 = vunpack.i.h.bf16 %v1201_v28 }
 0x187   :  { %336 = vmatpush.msra.mxu3 %v1202_v29 }
 0x18c   :  { %v1206_v30 = vpop.permute.xlu0 %1205  ;;  %v1221_v1 = vpop.permute.xlu1 %1220 }
 0x18d   :  { %v1207_v31 = vunpack.i.l.bf16 %v1206_v30  ;;  %v1208_v35 = vunpack.i.h.bf16 %v1206_v30  ;;  %v1222_v3 = vunpack.i.l.bf16 %v1221_v1  ;;  %v1223_v4 = vunpack.i.h.bf16 %v1221_v1 }
 0x18f   :  { %304 = vmatpush.msra.mxu2 %v1207_v31 }
 0x191   :  { %305 = vmatpush.msra.mxu2 %v1208_v35 }
 0x193   :  { %306 = vmatpush.msra.mxu2 %v1203_v39 }
 0x194   :  { %v1216_v58 = vpop.permute.xlu0 %1215 }
 0x195   :  { %432 = vmatpush.msrb.mxu2 %v413_v33  ;;  %v1217_v63 = vunpack.i.l.bf16 %v1216_v58  ;;  %v1218_v2 = vunpack.i.h.bf16 %v1216_v58  ;;  %v676_v58 = vld [vmem:[%s1793_s10 + $0x10] sm:$0xff] }
 0x197   :  { %433 = vmatpush.msrb.mxu2 %v412_v32 }
 0x199   :  { %434 = vmatpush.msrb.mxu2 %v411_v37 }
 0x19b   :  { %435 = vmatpush.msrb.mxu2 %v410_v34 }
 0x1a2   :  { %v227_v41 = vpop.f32.mrf.mxu2 }
 0x1a3   :  { %v228_v42 = vadd.f32 %v227_v41, %v198_v40 }
 0x1a5   :  { %v261_v43 = vsel %vm260_vm1, %v228_v42, -inf }
 0x1a6   :  { %262 = vmax.xlane.f32.xlu2 %v261_v43 }
 0x1a8   :  { %v257_v45 = vpop.f32.mrf.mxu3 }
 0x1a9   :  { %v258_v46 = vadd.f32 %v257_v45, %v199_v44 }
 0x1ab   :  { %v264_v47 = vsel %vm260_vm1, %v258_v46, -inf }
 0x1ae   :  { %265 = vmax.xlane.f32.xlu2 %v264_v47 }
 0x1c6   :  { %1210 = vrot.lane.b32.xlu2 %v1209_v48, %s1438_s17 }
 0x219   :  { %v263_v49 = vpop.xlane.xlu2 %262 }
 0x21a   :  { %v267_v50 = vsub.f32 %v228_v42, %v263_v49 }
 0x21c   :  { %v269_v51 = vmul.f32 1.442695, %v267_v50 }
 0x21e   :  { %1249 = vpow2.f32 %v269_v51 }
 0x221   :  { %v266_v52 = vpop.xlane.xlu2 %265 }
 0x222   :  { %v268_v53 = vsub.f32 %v258_v46, %v266_v52 }
 0x224   :  { %v1250_v54 = vpop.eup %1249  ;;  %v271_v55 = vmul.f32 1.442695, %v268_v53 }
 0x225   :  { %1132 = vmatmul.msk.f32.vlgmr.msra.gmra.mxu2 %vm260_vm1, %v1250_v54  ;;  %v273_v56 = vsel %vm260_vm1, %v1250_v54, 0.0  ;;  %v482_v54 = vld [vmem:[#allocation5] sm:$0xff] }
 0x226   :  { %1251 = vpow2.f32 %v271_v55  ;;  %274 = vadd.xlane.f32.xlu0 %v273_v56  ;;  %v677_v56 = vld [vmem:[%s1793_s10 + $0x18] sm:$0xff] }
 0x229   :  { %v1211_v57 = vpop.permute.xlu2 %1210 }
 0x22a   :  { %v1212_v59 = vunpack.i.l.bf16 %v1211_v57  ;;  %v1213_v62 = vunpack.i.h.bf16 %v1211_v57 }
 0x22c   :  { %v1252_v61 = vpop.eup %1251  ;;  %337 = vmatpush.msra.mxu3 %v1212_v59 }
 0x22d   :  { %v276_v0 = vsel %vm260_vm1, %v1252_v61, 0.0  ;;  %1136 = vmatmul.msk.f32.vlgmr.msrb.gmra.mxu2 %vm105_vm0, %v1628_v60 }
 0x22e   :  { %277 = vadd.xlane.f32.xlu1 %v276_v0  ;;  %338 = vmatpush.msra.mxu3 %v1213_v62  ;;  %v483_v62 = vld [vmem:[#allocation5 + $0x8] sm:$0xff] }
 0x22f   :  { %1133 = vmatmul.msk.f32.vlgmr.msra.gmra.mxu3 %vm260_vm1, %v1252_v61  ;;  %v675_v61 = vld [vmem:[%s1793_s10 + $0x8] sm:$0xff] }
 0x230   :  { %471 = vmatpush.msrb.mxu3 %v1217_v63  ;;  %v674_v63 = vld [vmem:[%s1793_s10] sm:$0xff] }
 0x232   :  { %472 = vmatpush.msrb.mxu3 %v1218_v2 }
 0x234   :  { %473 = vmatpush.msrb.mxu3 %v1222_v3  ;;  %v1229_v3 = vpack.i.bf16 %v676_v58, %v677_v56 }
 0x235   :  { %1137 = vmatmul.msk.f32.gmra.mxu2 %vm105_vm0, %v1634_v7 }
 0x236   :  { %474 = vmatpush.msrb.mxu3 %v1223_v4  ;;  %v1234_v4 = vpack.i.bf16 %v674_v63, %v675_v61 }
 0x237   :  { %1138 = vmatmul.msk.f32.vlgmr.msrb.gmra.mxu3 %vm105_vm0, %v1551_v5 }
 0x23f   :  { %1139 = vmatmul.msk.f32.gmra.mxu3 %vm105_vm0, %v1556_v6 }
 0x299   :  { %v275_v12 = vpop.xlane.xlu0 %274 }
 0x29a   :  { %1253 = vrcp.f32 %v275_v12  ;;  %v354_v21 = vand.u32 2147483648, %v275_v12  ;;  %v352_v23 = vand.u32 2147483647, %v275_v12  ;;  %vm348_vm3 = vweird.f32 %v275_v12 }
 0x29c   :  { %v355_v26 = vor.u32 1.1754944e-38, %v354_v21  ;;  %vm353_vm5 = vcmp.eq.f32.partialorder %v352_v23, 8.507059e+37 }
 0x2a0   :  { %v1254_v13 = vpop.eup %1253 }
 0x2a1   :  { %v344_v16 = vmul.f32 %v1254_v13, %v275_v12  ;;  %v278_v19 = vpop.xlane.xlu1 %277  ;;  %vm349_vm2 = vweird.f32 %v1254_v13 }
 0x2a2   :  { %1255 = vrcp.f32 %v278_v19  ;;  %vm350_vm4 = vmor %vm348_vm3, %vm349_vm2  ;;  %v369_v33 = vand.u32 2147483648, %v278_v19  ;;  %v367_v35 = vand.u32 2147483647, %v278_v19  ;;  %vm363_vm7 = vweird.f32 %v278_v19 }
 0x2a3   :  { %v345_v20 = vsub.f32 1.0, %v344_v16 }
 0x2a4   :  { %v370_v37 = vor.u32 1.1754944e-38, %v369_v33  ;;  %vm368_vm9 = vcmp.eq.f32.partialorder %v367_v35, 8.507059e+37 }
 0x2a5   :  { %v346_v22 = vmul.f32 %v1254_v13, %v345_v20 }
 0x2a7   :  { %v347_v24 = vadd.f32 %v1254_v13, %v346_v22 }
 0x2a8   :  { %v1256_v25 = vpop.eup %1255  ;;  %v308_v29 = vpop.f32.mrf.mxu2 }
 0x2a9   :  { %v359_v27 = vmul.f32 %v1256_v25, %v278_v19  ;;  %v351_v28 = vsel %vm350_vm4, %v1254_v13, %v347_v24  ;;  %vm364_vm6 = vweird.f32 %v1256_v25  ;;  %vm843_vm4 = vcmask 130048  }
 0x2aa   :  { %v356_v30 = vsel %vm353_vm5, %v355_v26, %v351_v28  ;;  %vm365_vm8 = vmor %vm363_vm7, %vm364_vm6  ;;  %v640_v28 = vld [vmem:[%s1792_s9 + $0x18] sm:$0xff] }
 0x2ab   :  { %v360_v31 = vsub.f32 1.0, %v359_v27  ;;  %v357_v32 = vmul.f32 %v356_v30, %v308_v29  ;;  %v639_v29 = vld [vmem:[%s1792_s9 + $0x10] sm:$0xff]  ;;  %v637_v30 = vld [vmem:[%s1792_s9] sm:$0xff] }
 0x2ad   :  { %1134 = vmatmul.msk.f32.vlgmr.msrb.gmra.mxu0 %vm105_vm0, %v357_v32  ;;  %v361_v34 = vmul.f32 %v1256_v25, %v360_v31 }
 0x2af   :  { %v362_v36 = vadd.f32 %v1256_v25, %v361_v34 }
 0x2b0   :  { %v437_v42 = vpop.f32.mrf.mxu2 }
 0x2b1   :  { %v366_v38 = vsel %vm365_vm8, %v1256_v25, %v362_v36 }
 0x2b2   :  { %v340_v39 = vpop.f32.mrf.mxu3  ;;  %v371_v40 = vsel %vm368_vm9, %v370_v37, %v366_v38 }
 0x2b3   :  { %v372_v41 = vmul.f32 %v371_v40, %v340_v39 }
 0x2b5   :  { %1135 = vmatmul.msk.f32.gmra.mxu0 %vm105_vm0, %v372_v41 }
 0x2b8   :  { %v440_v46 = vpop.f32.mrf.mxu2 }
 0x2ba   :  { %v476_v43 = vpop.f32.mrf.mxu3 }
 0x2bb   :  { %1140 = vmatpush.xpose.msk.msra.mxu0 %vm105_vm0, %v476_v43 }
 0x2be   :  { %1141 = vmatmul.msk.f32.vlgmr.msra.gmra.mxu0 %vm105_vm0, %v437_v42 }
 0x2bf   :  { %659 = vmatpush.msrb.mxu0 %v640_v28 }
 0x2c1   :  { %660 = vmatpush.msrb.mxu0 %v639_v29 }
 0x2c2   :  { %v479_v44 = vpop.f32.mrf.mxu3 }
 0x2c3   :  { %v1224_v45 = vpack.i.bf16 %v479_v44, %v476_v43  ;;  %1142 = vmatpush.xpose.msk.msrb.mxu1 %vm105_vm0, %v479_v44 }
 0x2c5   :  { %1225 = vrot.lane.b32.xlu1 %v1224_v45, %s1438_s17 }
 0x2c6   :  { %1143 = vmatmul.msk.f32.vlgmr.msrb.gmra.mxu1 %vm105_vm0, %v440_v46 }
 0x2c7   :  { %690 = vmatpush.msra.mxu1 %v677_v56 }
 0x2c9   :  { %691 = vmatpush.msra.mxu1 %v676_v58 }
 0x2cb   :  { %692 = vmatpush.msra.mxu1 %v675_v61 }
 0x2cd   :  { %693 = vmatpush.msra.mxu1 %v674_v63 }
 0x2ce   :  { %1148 = vmatmul.msk.f32.vlgmr.msra.gmra.mxu1 %vm105_vm0, %v1566_v14 }
 0x2d6   :  { %1149 = vmatmul.msk.f32.gmra.mxu1 %vm105_vm0, %v1581_v17 }
 0x2de   :  { %1150 = vmatmul.msk.f32.gmra.mxu1 %vm105_vm0, %v1571_v15 }
 0x2e6   :  { %1151 = vmatmul.msk.f32.gmra.mxu1 %vm105_vm0, %v1586_v18 }
 0x32a   :  { %v400_v47 = vpop.f32.mrf.mxu0 }
 0x32b   :  { %v406_v48 = vadd.f32 %v400_v47, %v1551_v5 }
 0x32d   :  { %408 = vst.msk [vmem:[#allocation9] sm:$0xff] %vm105_vm0, %v406_v48 }
 0x332   :  { %v403_v49 = vpop.f32.mrf.mxu0 }
 0x333   :  { %v407_v50 = vadd.f32 %v403_v49, %v1556_v6 }
 0x335   :  { %409 = vst.msk [vmem:[#allocation9 + $0x8] sm:$0xff] %vm105_vm0, %v407_v50 }
 0x337   :  { %v1226_v51 = vpop.permute.xlu1 %1225 }
 0x338   :  { %v1228_v52 = vunpack.i.h.bf16 %v1226_v51  ;;  %v1227_v53 = vunpack.i.l.bf16 %v1226_v51 }
 0x33a   :  { %576 = vmatpush.msra.mxu2 %v1227_v53  ;;  %602 = vmatpush.msra.mxu3 %v1228_v52 }
 0x33b   :  { %v507_v55 = vpop.f32.mrf.mxu0 }
 0x33c   :  { %v508_v57 = vadd.f32 %v507_v55, %v482_v54 }
 0x33e   :  { %v537_v59 = vsel %vm536_vm10, %v508_v57, -inf }
 0x33f   :  { %538 = vmax.xlane.f32.xlu2 %v537_v59 }
 0x343   :  { %v533_v0 = vpop.f32.mrf.mxu1 }
 0x344   :  { %v534_v1 = vadd.f32 %v533_v0, %v483_v62 }
 0x346   :  { %v540_v2 = vsel %vm536_vm10, %v534_v1, -inf }
 0x347   :  { %541 = vmax.xlane.f32.xlu0 %v540_v2 }
 0x34b   :  { %v695_v56 = vpop.f32.mrf.mxu1 }
 0x353   :  { %v698_v61 = vpop.f32.mrf.mxu1 }
 0x357   :  { %1230 = vrot.lane.b32.xlu2 %v1229_v3, %s1438_s17 }
 0x35b   :  { %1235 = vrot.lane.b32.xlu0 %v1234_v4, %s1438_s17  ;;  %v701_v63 = vpop.f32.mrf.mxu1 }
 0x3b2   :  { %v539_v8 = vpop.xlane.xlu2 %538 }
 0x3b3   :  { %v543_v9 = vsub.f32 %v508_v57, %v539_v8 }
 0x3b5   :  { %v545_v10 = vmul.f32 1.442695, %v543_v9 }
 0x3b7   :  { %1257 = vpow2.f32 %v545_v10 }
 0x3ba   :  { %v542_v11 = vpop.xlane.xlu0 %541  ;;  %v1231_v12 = vpop.permute.xlu2 %1230 }
 0x3bb   :  { %v544_v13 = vsub.f32 %v534_v1, %v542_v11  ;;  %v1233_v16 = vunpack.i.h.bf16 %v1231_v12  ;;  %v1232_v19 = vunpack.i.l.bf16 %v1231_v12  ;;  %v704_v1 = vpop.f32.mrf.mxu1  ;;  %v769_v12 = vld [vmem:[%s1788_s5] sm:$0xff] }
 0x3bd   :  { %v1258_v20 = vpop.eup %1257  ;;  %v547_v21 = vmul.f32 1.442695, %v544_v13  ;;  %758 = vmatpush.msrb.mxu3 %v1232_v19  ;;  %735 = vmatpush.msrb.mxu2 %v1232_v19 }
 0x3be   :  { %1144 = vmatmul.msk.f32.vlgmr.msra.gmra.mxu2 %vm536_vm10, %v1258_v20  ;;  %v549_v22 = vsel %vm536_vm10, %v1258_v20, 0.0 }
 0x3bf   :  { %1259 = vpow2.f32 %v547_v21  ;;  %550 = vadd.xlane.f32.xlu1 %v549_v22  ;;  %759 = vmatpush.msrb.mxu3 %v1233_v16  ;;  %v771_v22 = vld [vmem:[%s1788_s5 + $0x10] sm:$0xff] }
 0x3c0   :  { %736 = vmatpush.msrb.mxu2 %v1233_v16 }
 0x3c5   :  { %v1260_v23 = vpop.eup %1259 }
 0x3c6   :  { %1145 = vmatmul.msk.f32.vlgmr.msra.gmra.mxu3 %vm536_vm10, %v1260_v23  ;;  %v552_v24 = vsel %vm536_vm10, %v1260_v23, 0.0 }
 0x3c7   :  { %553 = vadd.xlane.f32.xlu0 %v552_v24 }
 0x3cd   :  { %v1236_v25 = vpop.permute.xlu0 %1235 }
 0x3ce   :  { %v1237_v26 = vunpack.i.l.bf16 %v1236_v25  ;;  %v1238_v27 = vunpack.i.h.bf16 %v1236_v25 }
 0x3d0   :  { %760 = vmatpush.msrb.mxu3 %v1237_v26  ;;  %737 = vmatpush.msrb.mxu2 %v1237_v26  ;;  %v772_v26 = vld [vmem:[%s1788_s5 + $0x18] sm:$0xff] }
 0x3d2   :  { %761 = vmatpush.msrb.mxu3 %v1238_v27  ;;  %738 = vmatpush.msrb.mxu2 %v1238_v27 }
 0x3d3   :  { %1154 = vmatmul.msk.f32.vlgmr.msrb.gmra.mxu3 %vm105_vm0, %v1628_v60  ;;  %1152 = vmatmul.msk.f32.vlgmr.msrb.gmra.mxu2 %vm105_vm0, %v1551_v5  ;;  %v638_v5 = vld [vmem:[%s1792_s9 + $0x8] sm:$0xff] }
 0x3d4   :  { %661 = vmatpush.msrb.mxu0 %v638_v5 }
 0x3d6   :  { %662 = vmatpush.msrb.mxu0 %v637_v30 }
 0x3db   :  { %1155 = vmatmul.msk.f32.gmra.mxu3 %vm105_vm0, %v1634_v7  ;;  %1153 = vmatmul.msk.f32.gmra.mxu2 %vm105_vm0, %v1556_v6 }
 0x432   :  { %v551_v6 = vpop.xlane.xlu1 %550 }
 0x433   :  { %1261 = vrcp.f32 %v551_v6  ;;  %v618_v35 = vand.u32 2147483648, %v551_v6  ;;  %v616_v37 = vand.u32 2147483647, %v551_v6  ;;  %vm612_vm12 = vweird.f32 %v551_v6 }
 0x435   :  { %v619_v40 = vor.u32 1.1754944e-38, %v618_v35  ;;  %vm617_vm14 = vcmp.eq.f32.partialorder %v616_v37, 8.507059e+37 }
 0x439   :  { %v1262_v31 = vpop.eup %1261 }
 0x43a   :  { %v608_v32 = vmul.f32 %v1262_v31, %v551_v6  ;;  %v554_v33 = vpop.xlane.xlu0 %553  ;;  %vm613_vm11 = vweird.f32 %v1262_v31 }
 0x43b   :  { %1263 = vrcp.f32 %v554_v33  ;;  %vm614_vm13 = vmor %vm612_vm12, %vm613_vm11  ;;  %v633_v47 = vand.u32 2147483648, %v554_v33  ;;  %v631_v49 = vand.u32 2147483647, %v554_v33  ;;  %vm627_vm1 = vweird.f32 %v554_v33 }
 0x43c   :  { %v609_v34 = vsub.f32 1.0, %v608_v32 }
 0x43d   :  { %v634_v51 = vor.u32 1.1754944e-38, %v633_v47  ;;  %vm632_vm3 = vcmp.eq.f32.partialorder %v631_v49, 8.507059e+37 }
 0x43e   :  { %v610_v36 = vmul.f32 %v1262_v31, %v609_v34 }
 0x440   :  { %v611_v38 = vadd.f32 %v1262_v31, %v610_v36 }
 0x441   :  { %v1264_v39 = vpop.eup %1263  ;;  %v578_v43 = vpop.f32.mrf.mxu2 }
 0x442   :  { %v623_v41 = vmul.f32 %v1264_v39, %v554_v33  ;;  %v615_v42 = vsel %vm614_vm13, %v1262_v31, %v611_v38  ;;  %vm628_vm15 = vweird.f32 %v1264_v39 }
 0x443   :  { %v620_v44 = vsel %vm617_vm14, %v619_v40, %v615_v42  ;;  %vm629_vm2 = vmor %vm627_vm1, %vm628_vm15 }
 0x444   :  { %v624_v45 = vsub.f32 1.0, %v623_v41  ;;  %v621_v46 = vmul.f32 %v620_v44, %v578_v43 }
 0x446   :  { %1146 = vmatmul.msk.f32.vlgmr.msrb.gmra.mxu0 %vm105_vm0, %v621_v46  ;;  %v625_v48 = vmul.f32 %v1264_v39, %v624_v45 }
 0x448   :  { %v626_v50 = vadd.f32 %v1264_v39, %v625_v48 }
 0x449   :  { %v604_v53 = vpop.f32.mrf.mxu3 }
 0x44a   :  { %v630_v52 = vsel %vm629_vm2, %v1264_v39, %v626_v50 }
 0x44b   :  { %v635_v54 = vsel %vm632_vm3, %v634_v51, %v630_v52  ;;  %v1013_v52 = vld [vmem:[#allocation7 + $0x18] sm:$0xff] }
 0x44c   :  { %v636_v55 = vmul.f32 %v635_v54, %v604_v53  ;;  %1038 = vmatpush.msrb.mxu1 %v1013_v52  ;;  %v1012_v53 = vld [vmem:[#allocation7 + $0x10] sm:$0xff]  ;;  %v1011_v54 = vld [vmem:[#allocation7 + $0x8] sm:$0xff] }
 0x44e   :  { %1147 = vmatmul.msk.f32.gmra.mxu0 %vm105_vm0, %v636_v55  ;;  %1039 = vmatpush.msrb.mxu1 %v1012_v53  ;;  %v1010_v55 = vld [vmem:[#allocation7] sm:$0xff] }
 0x450   :  { %1040 = vmatpush.msrb.mxu1 %v1011_v54 }
 0x452   :  { %1041 = vmatpush.msrb.mxu1 %v1010_v55 }
 0x456   :  { %v763_v57 = vpop.f32.mrf.mxu3  ;;  %v740_v58 = vpop.f32.mrf.mxu2 }
 0x457   :  { %1156 = vmatpush.xpose.msk.msra.mxu0 %vm105_vm0, %v763_v57  ;;  %v1239_v59 = vpack.i.bf16 %v740_v58, %v763_v57 }
 0x459   :  { %1240 = vrot.lane.b32.xlu0 %v1239_v59, %s1438_s17 }
 0x45b   :  { %1157 = vmatpush.xpose.msk.msra.mxu0 %vm105_vm0, %v740_v58 }
 0x45e   :  { %v766_v62 = vpop.f32.mrf.mxu3  ;;  %1158 = vmatmul.msk.f32.vlgmr.msra.gmra.mxu0 %vm105_vm0, %v695_v56  ;;  %v743_v0 = vpop.f32.mrf.mxu2 }
 0x45f   :  { %1160 = vmatpush.xpose.msk.msra.mxu2 %vm105_vm0, %v766_v62  ;;  %v1244_v5 = vpack.i.bf16 %v743_v0, %v766_v62 }
 0x463   :  { %1161 = vmatpush.xpose.msk.msra.mxu2 %vm105_vm0, %v743_v0 }
 0x466   :  { %1159 = vmatmul.msk.f32.gmra.mxu0 %vm105_vm0, %v698_v61  ;;  %1162 = vmatmul.msk.f32.vlgmr.msra.gmra.mxu2 %vm105_vm0, %v701_v63 }
 0x46e   :  { %1163 = vmatmul.msk.f32.gmra.mxu2 %vm105_vm0, %v704_v1 }
 0x4c3   :  { %v664_v2 = vpop.f32.mrf.mxu0 }
 0x4c4   :  { %v670_v3 = vadd.f32 %v664_v2, %v1628_v60 }
 0x4c6   :  { %672 = vst.msk [vmem:[#allocation11] sm:$0xff] %vm105_vm0, %v670_v3 }
 0x4cb   :  { %v667_v4 = vpop.f32.mrf.mxu0  ;;  %v1241_v8 = vpop.permute.xlu0 %1240 }
 0x4cc   :  { %v671_v9 = vadd.f32 %v667_v4, %v1634_v7  ;;  %v1242_v10 = vunpack.i.l.bf16 %v1241_v8  ;;  %v1243_v11 = vunpack.i.h.bf16 %v1241_v8  ;;  %v770_v7 = vld [vmem:[%s1788_s5 + $0x8] sm:$0xff]  ;;  %s1439_s5 = smov [#allocation9]  }
 0x4ce   :  { %673 = vst.msk [vmem:[#allocation11 + $0x8] sm:$0xff] %vm105_vm0, %v671_v9  ;;  %906 = vmatpush.msra.mxu3 %v1242_v10 }
 0x4d0   :  { %907 = vmatpush.msra.mxu3 %v1243_v11 }
 0x4db   :  { %v802_v13 = vpop.f32.mrf.mxu0 }
 0x4dc   :  { %v803_v16 = vadd.f32 %v802_v13, %v769_v12 }
 0x4de   :  { %v844_v60 = vsel %vm843_vm4, %v803_v16, -inf }
 0x4df   :  { %845 = vmax.xlane.f32.xlu2 %v844_v60 }
 0x4e3   :  { %v805_v19 = vpop.f32.mrf.mxu0 }
 0x4e4   :  { %v806_v20 = vadd.f32 %v805_v19, %v770_v7 }
 0x4e6   :  { %v847_v21 = vsel %vm843_vm4, %v806_v20, -inf }
 0x4e7   :  { %848 = vmax.xlane.f32.xlu1 %v847_v21 }
 0x4e9   :  { %v837_v23 = vpop.f32.mrf.mxu2 }
 0x4ea   :  { %v838_v24 = vadd.f32 %v837_v23, %v771_v22 }
 0x4ec   :  { %v850_v25 = vsel %vm843_vm4, %v838_v24, -inf }
 0x4ed   :  { %851 = vmax.xlane.f32.xlu2 %v850_v25 }
 0x4f1   :  { %v840_v27 = vpop.f32.mrf.mxu2 }
 0x4f2   :  { %v841_v28 = vadd.f32 %v840_v27, %v772_v26 }
 0x4f4   :  { %v853_v29 = vsel %vm843_vm4, %v841_v28, -inf }
 0x4f5   :  { %854 = vmax.xlane.f32.xlu1 %v853_v29 }
 0x505   :  { %1245 = vrot.lane.b32.xlu2 %v1244_v5, %s1438_s17  ;;  %s1080_s17 = sshll.u32 %s1439_s5, 4  ;;  %s1081_s17 = int_to_ptr.vmem [resolvable:$true] %s1080_s17 }
 0x506   :  { %1088 = dma.vmem_to_hbm [thread:$0]  %s1081_s17, 256, %s1083_s0, [#allocation10], %s1434_s21, %s1434_s21, %s1435_s22  }
 0x507   :  { %1101 = dma.vmem_to_hbm [thread:$0]  %s1094_s30, 256, %s1096_s18, [#allocation10], %s1434_s21, %s1434_s21, %s1435_s22  }
 0x552   :  { %v846_v30 = vpop.xlane.xlu2 %845 }
 0x553   :  { %v856_v6 = vsub.f32 %v803_v16, %v846_v30 }
 0x555   :  { %v860_v31 = vmul.f32 1.442695, %v856_v6 }
 0x557   :  { %1265 = vpow2.f32 %v860_v31 }
 0x55a   :  { %v849_v32 = vpop.xlane.xlu1 %848 }
 0x55b   :  { %v857_v33 = vsub.f32 %v806_v20, %v849_v32 }
 0x55d   :  { %v1266_v34 = vpop.eup %1265  ;;  %v862_v35 = vmul.f32 1.442695, %v857_v33 }
 0x55e   :  { %1164 = vmatmul.msk.f32.vlgmr.msra.gmra.mxu3 %vm843_vm4, %v1266_v34  ;;  %v868_v36 = vsel %vm843_vm4, %v1266_v34, 0.0 }
 0x55f   :  { %1267 = vpow2.f32 %v862_v35  ;;  %869 = vadd.xlane.f32.xlu1 %v868_v36 }
 0x560   :  { %v852_v37 = vpop.xlane.xlu2 %851 }
 0x561   :  { %v858_v38 = vsub.f32 %v838_v24, %v852_v37 }
 0x563   :  { %v864_v39 = vmul.f32 1.442695, %v858_v38 }
 0x565   :  { %v1268_v40 = vpop.eup %1267  ;;  %1269 = vpow2.f32 %v864_v39 }
 0x566   :  { %1165 = vmatmul.msk.f32.gmra.mxu3 %vm843_vm4, %v1268_v40  ;;  %v871_v41 = vsel %vm843_vm4, %v1268_v40, 0.0 }
 0x567   :  { %872 = vadd.xlane.f32.xlu0 %v871_v41 }
 0x568   :  { %v855_v42 = vpop.xlane.xlu1 %854  ;;  %v1246_v43 = vpop.permute.xlu2 %1245 }
 0x569   :  { %v859_v44 = vsub.f32 %v841_v28, %v855_v42  ;;  %v1247_v45 = vunpack.i.l.bf16 %v1246_v43  ;;  %v1248_v48 = vunpack.i.h.bf16 %v1246_v43 }
 0x56b   :  { %v1270_v46 = vpop.eup %1269  ;;  %v866_v47 = vmul.f32 1.442695, %v859_v44  ;;  %941 = vmatpush.msrb.mxu0 %v1247_v45 }
 0x56c   :  { %v874_v49 = vsel %vm843_vm4, %v1270_v46, 0.0 }
 0x56d   :  { %1271 = vpow2.f32 %v866_v47  ;;  %875 = vadd.xlane.f32.xlu1 %v874_v49  ;;  %942 = vmatpush.msrb.mxu0 %v1248_v48 }
 0x56e   :  { %1166 = vmatmul.msk.f32.vlgmr.msrb.gmra.mxu0 %vm843_vm4, %v1270_v46 }
 0x573   :  { %v1272_v50 = vpop.eup %1271 }
 0x574   :  { %v877_v51 = vsel %vm843_vm4, %v1272_v50, 0.0 }
 0x575   :  { %878 = vadd.xlane.f32.xlu1 %v877_v51 }
 0x576   :  { %1167 = vmatmul.msk.f32.gmra.mxu0 %vm843_vm4, %v1272_v50 }
 0x5d2   :  { %v870_v56 = vpop.xlane.xlu1 %869 }
 0x5d3   :  { %1273 = vrcp.f32 %v870_v56  ;;  %v961_v62 = vand.u32 2147483648, %v870_v56  ;;  %v959_v0 = vand.u32 2147483647, %v870_v56  ;;  %vm955_vm6 = vweird.f32 %v870_v56 }
 0x5d5   :  { %v962_v8 = vor.u32 1.1754944e-38, %v961_v62  ;;  %vm960_vm8 = vcmp.eq.f32.partialorder %v959_v0, 8.507059e+37 }
 0x5d9   :  { %v1274_v57 = vpop.eup %1273 }
 0x5da   :  { %v951_v58 = vmul.f32 %v1274_v57, %v870_v56  ;;  %v873_v59 = vpop.xlane.xlu0 %872  ;;  %vm956_vm5 = vweird.f32 %v1274_v57 }
 0x5db   :  { %1275 = vrcp.f32 %v873_v59  ;;  %vm957_vm7 = vmor %vm955_vm6, %vm956_vm5  ;;  %v976_v16 = vand.u32 2147483648, %v873_v59  ;;  %v974_v7 = vand.u32 2147483647, %v873_v59  ;;  %vm970_vm10 = vweird.f32 %v873_v59 }
 0x5dc   :  { %v952_v61 = vsub.f32 1.0, %v951_v58 }
 0x5dd   :  { %v977_v23 = vor.u32 1.1754944e-38, %v976_v16  ;;  %vm975_vm12 = vcmp.eq.f32.partialorder %v974_v7, 8.507059e+37 }
 0x5de   :  { %v953_v63 = vmul.f32 %v1274_v57, %v952_v61 }
 0x5e0   :  { %v876_v1 = vpop.xlane.xlu1 %875  ;;  %v954_v2 = vadd.f32 %v1274_v57, %v953_v63 }
 0x5e1   :  { %v1276_v3 = vpop.eup %1275  ;;  %1277 = vrcp.f32 %v876_v1  ;;  %v909_v4 = vpop.f32.mrf.mxu3  ;;  %v991_v28 = vand.u32 2147483648, %v876_v1  ;;  %v989_v30 = vand.u32 2147483647, %v876_v1  ;;  %vm985_vm14 = vweird.f32 %v876_v1 }
 0x5e2   :  { %v966_v9 = vmul.f32 %v1276_v3, %v873_v59  ;;  %v958_v10 = vsel %vm957_vm7, %v1274_v57, %v954_v2  ;;  %vm971_vm9 = vweird.f32 %v1276_v3 }
 0x5e3   :  { %v963_v11 = vsel %vm960_vm8, %v962_v8, %v958_v10  ;;  %vm972_vm11 = vmor %vm970_vm10, %vm971_vm9  ;;  %v992_v32 = vor.u32 1.1754944e-38, %v991_v28  ;;  %vm990_vm1 = vcmp.eq.f32.partialorder %v989_v30, 8.507059e+37 }
 0x5e4   :  { %v967_v12 = vsub.f32 1.0, %v966_v9  ;;  %v964_v13 = vmul.f32 %v963_v11, %v909_v4 }
 0x5e6   :  { %v968_v60 = vmul.f32 %v1276_v3, %v967_v12  ;;  %1168 = vmatmul.msk.f32.vlgmr.msrb.gmra.mxu1 %vm105_vm0, %v964_v13 }
 0x5e7   :  { %v1278_v19 = vpop.eup %1277 }
 0x5e8   :  { %v981_v20 = vmul.f32 %v1278_v19, %v876_v1  ;;  %v879_v21 = vpop.xlane.xlu1 %878  ;;  %v969_v22 = vadd.f32 %v1276_v3, %v968_v60  ;;  %vm986_vm13 = vweird.f32 %v1278_v19 }
 0x5e9   :  { %1279 = vrcp.f32 %v879_v21  ;;  %v912_v26 = vpop.f32.mrf.mxu3  ;;  %vm987_vm15 = vmor %vm985_vm14, %vm986_vm13  ;;  %v1006_v38 = vand.u32 2147483648, %v879_v21  ;;  %v1004_v41 = vand.u32 2147483647, %v879_v21  ;;  %vm1000_vm3 = vweird.f32 %v879_v21 }
 0x5ea   :  { %v982_v24 = vsub.f32 1.0, %v981_v20  ;;  %v973_v25 = vsel %vm972_vm11, %v1276_v3, %v969_v22 }
 0x5eb   :  { %v978_v27 = vsel %vm975_vm12, %v977_v23, %v973_v25  ;;  %v944_v35 = vpop.f32.mrf.mxu0  ;;  %v1007_v43 = vor.u32 1.1754944e-38, %v1006_v38  ;;  %vm1005_vm5 = vcmp.eq.f32.partialorder %v1004_v41, 8.507059e+37 }
 0x5ec   :  { %v979_v29 = vmul.f32 %v978_v27, %v912_v26  ;;  %v983_v5 = vmul.f32 %v1278_v19, %v982_v24 }
 0x5ee   :  { %v984_v6 = vadd.f32 %v1278_v19, %v983_v5  ;;  %1169 = vmatmul.msk.f32.gmra.mxu1 %vm105_vm0, %v979_v29 }
 0x5ef   :  { %v1280_v31 = vpop.eup %1279 }
 0x5f0   :  { %v996_v33 = vmul.f32 %v1280_v31, %v879_v21  ;;  %v988_v34 = vsel %vm987_vm15, %v1278_v19, %v984_v6  ;;  %vm1001_vm2 = vweird.f32 %v1280_v31 }
 0x5f1   :  { %v993_v36 = vsel %vm990_vm1, %v992_v32, %v988_v34  ;;  %vm1002_vm4 = vmor %vm1000_vm3, %vm1001_vm2 }
 0x5f2   :  { %v997_v37 = vsub.f32 1.0, %v996_v33  ;;  %v994_v40 = vmul.f32 %v993_v36, %v944_v35 }
 0x5f3   :  { %v947_v46 = vpop.f32.mrf.mxu0 }
 0x5f4   :  { %v998_v39 = vmul.f32 %v1280_v31, %v997_v37 }
 0x5f6   :  { %v999_v42 = vadd.f32 %v1280_v31, %v998_v39  ;;  %1170 = vmatmul.msk.f32.gmra.mxu1 %vm105_vm0, %v994_v40 }
 0x5f8   :  { %v1003_v44 = vsel %vm1002_vm4, %v1280_v31, %v999_v42 }
 0x5f9   :  { %v1008_v45 = vsel %vm1005_vm5, %v1007_v43, %v1003_v44 }
 0x5fa   :  { %v1009_v47 = vmul.f32 %v1008_v45, %v947_v46 }
 0x5fe   :  { %1171 = vmatmul.msk.f32.gmra.mxu1 %vm105_vm0, %v1009_v47 }
 0x663   :  { %v1043_v48 = vpop.f32.mrf.mxu1 }
 0x664   :  { %v1055_v49 = vadd.f32 %v1043_v48, %v1566_v14 }
 0x666   :  { %1059 = vst.msk [vmem:[#allocation8] sm:$0xff] %vm105_vm0, %v1055_v49 }
 0x66b   :  { %v1046_v50 = vpop.f32.mrf.mxu1 }
 0x66c   :  { %v1056_v51 = vadd.f32 %v1046_v50, %v1581_v17 }
 0x66e   :  { %1060 = vst.msk [vmem:[#allocation8 + $0x8] sm:$0xff] %vm105_vm0, %v1056_v51 }
 0x673   :  { %v1049_v52 = vpop.f32.mrf.mxu1 }
 0x674   :  { %v1057_v53 = vadd.f32 %v1049_v52, %v1571_v15 }
 0x676   :  { %1061 = vst.msk [vmem:[#allocation8 + $0x10] sm:$0xff] %vm105_vm0, %v1057_v53 }
 0x67b   :  { %v1052_v54 = vpop.f32.mrf.mxu1 }
 0x67c   :  { %v1058_v14 = vadd.f32 %v1052_v54, %v1586_v18 }
 0x67e   :  { %1062 = vst.msk [vmem:[#allocation8 + $0x18] sm:$0xff] %vm105_vm0, %v1058_v14 }
 0x67f   :  { %1075 = dma.vmem_to_hbm [thread:$0]  %s1068_s14, 512, %s1070_s20, [#allocation4], %s1434_s21, %s1434_s21, %s1435_s22  }
 0x680   :  { %1429 = dma.done.wait [#allocation4], 512  }
 0x681   :  { %1430 = vsyncadd [#allocation4], 4294966784 }
 0x682   :  { %1431 = dma.done.wait [#allocation10], 512  }
 0x683   :  { %1432 = vsyncadd [#allocation10], 4294966784 }
 0x684   :  { %1114 = vsyncpa [#allocation3], 1 }
 0x685   :  { %1115 = vsyncpa [#allocation6], 1 }
 0x686   :  { %1116 = vsyncpa [#allocation4], 1 }
 0x687   :  { %1117 = vsyncpa [#allocation10], 1 }

</bundles_post_ra>
